<compile_context>
chip_gen: v6e
topology: v6e:2x2x1
jax: 0.10.0
libtpu: 0.0.40
codegen_flags: <defaults>
</compile_context>

<pallas_src>
import functools
import math

import jax
import jax.numpy as jnp
from jax.experimental import pallas as pl
from jax.experimental.pallas import tpu as pltpu

F32 = jnp.float32
MXU_DTYPE = jnp.bfloat16  # MXU-native input dtype; accumulation stays f32.


def _round_up(x, m):
    return (x + m - 1) // m * m


# ---------------------------------------------------------------------------
# Fused Pallas kernel.  One grid step handles a (TM, K) slab of x:
#   h = x @ W0 + b0
#   repeat (n_layers - 1) times: h = relu(h) @ W + b      (dropout == identity)
# and writes the final (TM, N) block.  MXU matmuls take bf16 inputs with f32
# accumulation; the activation never leaves VMEM/vregs.
# ---------------------------------------------------------------------------
def _ann_fused_kernel(x_ref, w0_ref, b0_ref, w_ref, b_ref, o_ref, *, n_layers):
    x = x_ref[...].astype(MXU_DTYPE)  # in-kernel cast (cheap VPU op, hidden by DMA)
    h = jnp.dot(x, w0_ref[...], preferred_element_type=jnp.float32) + b0_ref[...]
    for _ in range(n_layers - 1):
        # TODO(synk): nn.Dropout treated as identity (inference mode only).
        a = jnp.maximum(h, 0.0).astype(MXU_DTYPE)
        h = jnp.dot(a, w_ref[...], preferred_element_type=jnp.float32) + b_ref[...]
    o_ref[...] = h  # single store per output block


# ---------------------------------------------------------------------------
# One-time weight packing (hoisted out of the jitted hot path).
#   fc0_w: (reduced, input), fc_w: (reduced, reduced)   -- PyTorch layout.
# Weights are transposed, zero-padded to multiples of 128 and cast to bf16.
# Biases stay UNPADDED so the true reduced_size is a static array shape.
# ---------------------------------------------------------------------------
def pack_params(fc0_w, fc0_b, fc_w, fc_b):
    N, K = fc0_w.shape
    pk = _round_up(K, 128)
    pn = _round_up(N, 128)
    w0p = jnp.pad(fc0_w.T.astype(F32), ((0, pk - K), (0, pn - N))).astype(MXU_DTYPE)
    wp = jnp.pad(fc_w.T.astype(F32), ((0, pn - N), (0, pn - N))).astype(MXU_DTYPE)
    return {
        "w0": w0p,                # (pk, pn) bf16
        "w": wp,                  # (pn, pn) bf16
        "b0": fc0_b.astype(F32),  # (N,) unpadded f32
        "b": fc_b.astype(F32),    # (N,) unpadded f32
    }


def _bias_row(b, pn):
    n = b.shape[0]
    if n != pn:
        b = jnp.pad(b, (0, pn - n))
    return b.reshape(1, pn)


# ---------------------------------------------------------------------------
# ANN forward: x (..., input_size) -> (..., reduced_size), one pallas_call.
# ---------------------------------------------------------------------------
def ann_forward(packed, x, n_ANNlayers=1):
    lead = x.shape[:-1]
    K = x.shape[-1]
    h2 = x.reshape(-1, K)
    M = h2.shape[0]

    w0p, wp = packed["w0"], packed["w"]
    pk, pn = w0p.shape
    assert pk >= K  # static shapes -> safe under jit
    N = packed["b0"].shape[0]
    b0p = _bias_row(packed["b0"], pn)
    bp = _bias_row(packed["b"], pn)

    # Tile only the flattened batch dim; full-K blocks (fewer grid steps beats
    # smaller tiles at these shapes -- VMEM footprint is only a few MiB).
    TM = min(256, _round_up(M, 16))
    pm = _round_up(M, TM)
    if (pm, pk) != (M, K):  # no pad op when already tile aligned (16 x 4096 is)
        h2 = jnp.pad(h2, ((0, pm - M), (0, pk - K)))

    grid = (pm // TM,)
    out = pl.pallas_call(
        functools.partial(_ann_fused_kernel, n_layers=n_ANNlayers),
        out_shape=jax.ShapeDtypeStruct((pm, pn), F32),
        grid_spec=pltpu.PrefetchScalarGridSpec(
            num_scalar_prefetch=0,
            grid=grid,
            in_specs=[
                pl.BlockSpec((TM, pk), lambda i: (i, 0)),  # x slab (f32, full K)
                pl.BlockSpec((pk, pn), lambda i: (0, 0)),  # W0 bf16, resident
                pl.BlockSpec((1, pn), lambda i: (0, 0)),   # b0
                pl.BlockSpec((pn, pn), lambda i: (0, 0)),  # W  bf16, resident
                pl.BlockSpec((1, pn), lambda i: (0, 0)),   # b
            ],
            out_specs=pl.BlockSpec((TM, pn), lambda i: (i, 0)),
        ),
        compiler_params=pltpu.CompilerParams(
            dimension_semantics=("parallel",),
            # Explicit headroom (v5e scoped default is 16 MiB); worst case here
            # is ~10 MiB with TM=256 full-K f32 x slabs, double buffered.
            vmem_limit_bytes=32 * 1024 * 1024,
        ),
    )(h2, w0p, b0p, wp, bp)

    return out[:M, :N].reshape(*lead, N)


ann_forward_jit = jax.jit(ann_forward, static_argnames=("n_ANNlayers",))


# ---------------------------------------------------------------------------
# Pure-JAX reference (same bf16 MXU inputs, f32 accumulation)
# ---------------------------------------------------------------------------
def ann_reference(params, x, n_ANNlayers=1):
    def lin(a, w, b):
        return jnp.dot(a.astype(MXU_DTYPE), w.T.astype(MXU_DTYPE),
                       preferred_element_type=jnp.float32) + b

    h = lin(x, params["fc0_w"], params["fc0_b"])
    for _ in range(n_ANNlayers - 1):
        h = lin(jnp.maximum(h, 0.0), params["fc_w"], params["fc_b"])
    return h


# ---------------------------------------------------------------------------
# Deterministic parameter init (PyTorch nn.Linear default: U(-1/sqrt(fan_in), .))
# ---------------------------------------------------------------------------
def init_params(key, input_size=4096, reduced_size=128):
    k0, k1, k2, k3 = jax.random.split(key, 4)
    b0 = 1.0 / math.sqrt(input_size)
    b1 = 1.0 / math.sqrt(reduced_size)
    return {
        "fc0_w": jax.random.uniform(k0, (reduced_size, input_size), F32, -b0, b0),
        "fc0_b": jax.random.uniform(k1, (reduced_size,), F32, -b0, b0),
        "fc_w": jax.random.uniform(k2, (reduced_size, reduced_size), F32, -b1, b1),
        "fc_b": jax.random.uniform(k3, (reduced_size,), F32, -b1, b1),
    }


if __name__ == "__main__":
    key = jax.random.PRNGKey(0)
    kp, kx = jax.random.split(key)

    INPUT_SIZE = 4096   # module default
    REDUCED = 128       # module default
    B, L = 2, 8         # 2 videos x 8 frame features each -> M = 16

    params = init_params(kp, INPUT_SIZE, REDUCED)
    packed = pack_params(params["fc0_w"], params["fc0_b"],
                         params["fc_w"], params["fc_b"])
    x = jax.random.normal(kx, (B, L, INPUT_SIZE), F32)

    ok = True
    for n_layers in (1, 2):  # default config + one that exercises the relu/fc path
        out = ann_forward_jit(packed, x, n_ANNlayers=n_layers)
        out = jax.block_until_ready(out)
        assert out.shape == (B, L, REDUCED)
        assert bool(jnp.all(jnp.isfinite(out)))
        ref = ann_reference(params, x, n_ANNlayers=n_layers)
        err = float(jnp.max(jnp.abs(out - ref)))
        scale = float(jnp.max(jnp.abs(ref))) + 1e-6
        if err > 2e-3 * scale:
            ok = False
            print(f"MISMATCH n_layers={n_layers}: err={err} scale={scale}")

    if ok:
        print("KERNEL_OK")
</pallas_src>

<mosaic_0001>
module attributes {stable_mosaic.version = 11 : i64} {
  func.func @_ann_fused_kernel(%arg0: i32, %arg1: memref<16x4096xf32, #tpu.memory_space<vmem>>, %arg2: memref<4096x128xbf16, #tpu.memory_space<vmem>>, %arg3: memref<1x128xf32, #tpu.memory_space<vmem>>, %arg4: memref<128x128xbf16, #tpu.memory_space<vmem>>, %arg5: memref<1x128xf32, #tpu.memory_space<vmem>>, %arg6: memref<16x128xf32, #tpu.memory_space<vmem>>) attributes {dimension_semantics = [#tpu.dimension_semantics<parallel>], iteration_bounds = array<i64: 1>, scalar_prefetch = 0 : i64, scratch_operands = 0 : i64, tpu.core_type = #tpu.core_type<tc>, window_params = [{transform_indices = @transform_0, window_bounds = array<i64: 16, 4096>}, {pipeline_mode = #tpu.pipeline_mode<synchronous>, transform_indices = @transform_1, window_bounds = array<i64: 4096, 128>}, {pipeline_mode = #tpu.pipeline_mode<synchronous>, transform_indices = @transform_2, window_bounds = array<i64: 1, 128>}, {pipeline_mode = #tpu.pipeline_mode<synchronous>, transform_indices = @transform_3, window_bounds = array<i64: 128, 128>}, {pipeline_mode = #tpu.pipeline_mode<synchronous>, transform_indices = @transform_4, window_bounds = array<i64: 1, 128>}, {transform_indices = @transform_5, window_bounds = array<i64: 16, 128>}]} {
    %c0 = arith.constant 0 : index
    %c0_0 = arith.constant 0 : index
    %0 = vector.load %arg1[%c0, %c0_0] : memref<16x4096xf32, #tpu.memory_space<vmem>>, vector<16x4096xf32>
    %1 = arith.truncf %0 : vector<16x4096xf32> to vector<16x4096xbf16>
    %c0_1 = arith.constant 0 : index
    %c0_2 = arith.constant 0 : index
    %2 = vector.load %arg2[%c0_1, %c0_2] : memref<4096x128xbf16, #tpu.memory_space<vmem>>, vector<4096x128xbf16>
    %cst = arith.constant dense<0.000000e+00> : vector<16x128xf32>
    %3 = tpu.matmul %1, %2, %cst {dimension_numbers = #tpu.dot_dimension_numbers<[1], [0], [0], [1], [0, 0, 1, 1], [], []>} : vector<16x4096xbf16>, vector<4096x128xbf16>, vector<16x128xf32> -> vector<16x128xf32>
    %c0_3 = arith.constant 0 : index
    %c0_4 = arith.constant 0 : index
    %4 = vector.load %arg3[%c0_3, %c0_4] : memref<1x128xf32, #tpu.memory_space<vmem>>, vector<1x128xf32>
    %5 = vector.broadcast %4 : vector<1x128xf32> to vector<16x128xf32>
    %6 = arith.addf %3, %5 : vector<16x128xf32>
    %c0_5 = arith.constant 0 : index
    %c0_6 = arith.constant 0 : index
    %7 = vector.load %arg6[%c0_5, %c0_6] : memref<16x128xf32, #tpu.memory_space<vmem>>, vector<16x128xf32>
    tpu.vector_store %arg6[%c0_5, %c0_6], %6 {strides = array<i32>} : memref<16x128xf32, #tpu.memory_space<vmem>>, vector<16x128xf32>,
    return
  }
  func.func @transform_0(%arg0: i32) -> (i32, i32) {
    %c0_i32 = arith.constant 0 : i32
    %c0_i32_0 = arith.constant 0 : i32
    return %arg0, %c0_i32 : i32, i32
  }
  func.func @transform_1(%arg0: i32) -> (i32, i32) {
    %c0_i32 = arith.constant 0 : i32
    %c0_i32_0 = arith.constant 0 : i32
    %c0_i32_1 = arith.constant 0 : i32
    return %c0_i32, %c0_i32_0 : i32, i32
  }
  func.func @transform_2(%arg0: i32) -> (i32, i32) {
    %c0_i32 = arith.constant 0 : i32
    %c0_i32_0 = arith.constant 0 : i32
    %c0_i32_1 = arith.constant 0 : i32
    return %c0_i32, %c0_i32_0 : i32, i32
  }
  func.func @transform_3(%arg0: i32) -> (i32, i32) {
    %c0_i32 = arith.constant 0 : i32
    %c0_i32_0 = arith.constant 0 : i32
    %c0_i32_1 = arith.constant 0 : i32
    return %c0_i32, %c0_i32_0 : i32, i32
  }
  func.func @transform_4(%arg0: i32) -> (i32, i32) {
    %c0_i32 = arith.constant 0 : i32
    %c0_i32_0 = arith.constant 0 : i32
    %c0_i32_1 = arith.constant 0 : i32
    return %c0_i32, %c0_i32_0 : i32, i32
  }
  func.func @transform_5(%arg0: i32) -> (i32, i32) {
    %c0_i32 = arith.constant 0 : i32
    %c0_i32_0 = arith.constant 0 : i32
    return %arg0, %c0_i32 : i32, i32
  }
}

</mosaic_0001>

<bundles_post_ra>
// kernel: ann_forward.1
= control target key start
LH: loop header
LB: loop body
LE: loop exit
PB: predicated region body
PF: predicated region fallthrough
CT: control target
= control target key end

     0   :  { %10 = vsyncpa [#allocation3], 0  ;;  %s3906_s0 = inlined_call_operand.hbm [shape: f32[16,4096], index: 0, kind: input, shape index: {}]   ;;  %s3907_s1 = inlined_call_operand.hbm [shape: bf16[4096,128], index: 1, kind: input, shape index: {}]   ;;  %s3908_s2 = inlined_call_operand.vmem [shape: f32[1,128], index: 2, kind: input, shape index: {}]   ;;  %s3909_s3 = inlined_call_operand.hbm [shape: bf16[128,128], index: 3, kind: input, shape index: {}]   ;;  %s3910_s4 = inlined_call_operand.vmem [shape: f32[1,128], index: 4, kind: input, shape index: {}]   ;;  %s3911_s5 = inlined_call_operand.hbm [shape: f32[16,128], index: 5, kind: output, shape index: {}]  }
   0x1   :  { %11 = vsyncpa [#allocation6], 0 }
   0x2   :  { %12 = vsyncpa [#allocation4], 0  ;;  %s3851_s18 = smov [#allocation5]  }
   0x3   :  { %s30_s19 = sshll.u32 %s3851_s18, 4  ;;  %s31_s19 = int_to_ptr.vmem [resolvable:$true] %s30_s19 }
   0x4   :  { %s3773_s20 = scalar_lea.vmem %s31_s19, 32768  ;;  %p3778_p1 = scmp.lt.s32.totalorder %s31_s19, %s31_s19 }
   0x5   :  { %p3774_p0 = scmp.ne.s32.totalorder %s31_s19, %s3773_s20  ;;  %p3779_p2 = scmp.lt.s32.totalorder %s3773_s20, %s3773_s20 }
   0x7   :  { %p3780_p3 = por %p3779_p2, %p3778_p1 }
   0x9   :  { %p3781_p4 = pnand %p3780_p3, %p3774_p0 }
   0xb   :  { %3784 = shalt.err (!%p3781_p4)
}
   0xc   :  { %s3852_s21 = smov 64   ;;  %s3853_s22 = smov 4  }
   0xd   :  { %36 = dma.hbm_to_vmem [thread:$0]  %s3907_s1, 32768, %s31_s19, [#allocation6], %s3852_s21, %s3852_s21, %s3853_s22  }
   0xe   :  { %s3854_s24 = smov [#allocation2]  }
   0xf   :  { %s18_s25 = sshll.u32 %s3854_s24, 4  ;;  %s19_s25 = int_to_ptr.vmem [resolvable:$true] %s18_s25 }
  0x10   :  { %s3793_s26 = scalar_lea.vmem %s19_s25, 8192  ;;  %p3798_p6 = scmp.lt.s32.totalorder %s19_s25, %s19_s25 }
  0x11   :  { %p3794_p5 = scmp.ne.s32.totalorder %s19_s25, %s3793_s26  ;;  %p3799_p7 = scmp.lt.s32.totalorder %s3793_s26, %s3793_s26 }
  0x13   :  { %p3800_p8 = por %p3799_p7, %p3798_p6 }
  0x15   :  { %p3801_p9 = pnand %p3800_p8, %p3794_p5 }
  0x17   :  { %3804 = shalt.err (!%p3801_p9)
}
  0x18   :  { %s3855_s27 = smov 4096   ;;  %s3856_s28 = smov 256  }
  0x19   :  { %24 = dma.hbm_to_vmem [thread:$0]  %s3906_s0, 8192, %s19_s25, [#allocation3], %s3855_s27, %s3855_s27, %s3856_s28  }
  0x1a   :  { %s3857_s6 = smov [#allocation7]  }
  0x1b   :  { %s44_s7 = sshll.u32 %s3857_s6, 4  ;;  %s45_s7 = int_to_ptr.vmem [resolvable:$true] %s44_s7 }
  0x1c   :  { %s3813_s1 = scalar_lea.vmem %s45_s7, 1024  ;;  %p3818_p11 = scmp.lt.s32.totalorder %s45_s7, %s45_s7 }
  0x1d   :  { %p3814_p10 = scmp.ne.s32.totalorder %s45_s7, %s3813_s1  ;;  %p3819_p12 = scmp.lt.s32.totalorder %s3813_s1, %s3813_s1 }
  0x1f   :  { %p3820_p13 = por %p3819_p12, %p3818_p11 }
  0x21   :  { %p3821_p0 = pnand %p3820_p13, %p3814_p10 }
  0x23   :  { %3824 = shalt.err (!%p3821_p0)
}
  0x24   :  { %50 = dma.hbm_to_vmem [thread:$0]  %s3909_s3, 1024, %s45_s7, [#allocation6], %s3852_s21, %s3852_s21, %s3853_s22  }
  0x25   :  { %3845 = dma.done.wait [#allocation3], 8192  }
  0x26   :  { %3846 = vsyncadd [#allocation3], 4294959104 }
  0x27   :  { %3847 = dma.done.wait [#allocation6], 33792  }
  0x28   :  { %3848 = vsyncadd [#allocation6], 4294933504  ;;  %v3509_v0 = vld [vmem:[#allocation5 + $0x78] sm:$0xff]   ;;  %v3513_v4 = vld [vmem:[#allocation5 + $0x70] sm:$0xff]  }
  0x29   :  { %v3510_v1 = vld [vmem:[#allocation5 + $0xf8] sm:$0xff]   ;;  %3147 = vmatprep.subr.bf16.mxu0 %v3509_v0  ;;  %v3514_v5 = vld [vmem:[#allocation5 + $0xf0] sm:$0xff]   ;;  %v3517_v8 = vld [vmem:[#allocation5 + $0x68] sm:$0xff]  }
  0x2a   :  { %v3511_v2 = vld [vmem:[#allocation5 + $0x38] sm:$0xff]   ;;  %3169 = vmatprep.subr.bf16.mxu1 %v3510_v1  ;;  %v3515_v6 = vld [vmem:[#allocation5 + $0x30] sm:$0xff]   ;;  %v3518_v9 = vld [vmem:[#allocation5 + $0xe8] sm:$0xff]  }
  0x2b   :  { %v3512_v3 = vld [vmem:[#allocation5 + $0xb8] sm:$0xff]   ;;  %3148 = vmatpush3.bf16.msra.mxu0 %v3511_v2  ;;  %v3516_v7 = vld [vmem:[#allocation5 + $0xb0] sm:$0xff]   ;;  %v3519_v10 = vld [vmem:[#allocation5 + $0x28] sm:$0xff]  }
  0x2c   :  { %3170 = vmatpush3.bf16.msra.mxu1 %v3512_v3  ;;  %3149 = vmatprep.subr.bf16.mxu0 %v3513_v4  ;;  %v3520_v11 = vld [vmem:[#allocation5 + $0xa8] sm:$0xff]   ;;  %v3521_v12 = vld [vmem:[#allocation5 + $0x60] sm:$0xff]   ;;  %v3525_v16 = vld [vmem:[#allocation5 + $0x58] sm:$0xff]  }
  0x2d   :  { %3171 = vmatprep.subr.bf16.mxu1 %v3514_v5  ;;  %v3522_v13 = vld [vmem:[#allocation5 + $0xe0] sm:$0xff]   ;;  %v3526_v17 = vld [vmem:[#allocation5 + $0xd8] sm:$0xff]   ;;  %v3529_v20 = vld [vmem:[#allocation5 + $0x50] sm:$0xff]  }
  0x2e   :  { %v3523_v14 = vld [vmem:[#allocation5 + $0x20] sm:$0xff]   ;;  %v3527_v18 = vld [vmem:[#allocation5 + $0x18] sm:$0xff]   ;;  %v3530_v21 = vld [vmem:[#allocation5 + $0xd0] sm:$0xff]  }
  0x2f   :  { %3150 = vmatpush3.bf16.msra.mxu0 %v3515_v6  ;;  %v3524_v15 = vld [vmem:[#allocation5 + $0xa0] sm:$0xff]   ;;  %v3528_v19 = vld [vmem:[#allocation5 + $0x98] sm:$0xff]   ;;  %v3531_v22 = vld [vmem:[#allocation5 + $0x10] sm:$0xff]  }
  0x30   :  { %3172 = vmatpush3.bf16.msra.mxu1 %v3516_v7  ;;  %3151 = vmatprep.subr.bf16.mxu0 %v3517_v8  ;;  %v3532_v23 = vld [vmem:[#allocation5 + $0x90] sm:$0xff]   ;;  %v3533_v24 = vld [vmem:[#allocation5 + $0x48] sm:$0xff]   ;;  %v3537_v28 = vld [vmem:[#allocation5 + $0x40] sm:$0xff]  }
  0x31   :  { %3173 = vmatprep.subr.bf16.mxu1 %v3518_v9  ;;  %v3534_v25 = vld [vmem:[#allocation5 + $0xc8] sm:$0xff]   ;;  %v3538_v29 = vld [vmem:[#allocation5 + $0xc0] sm:$0xff]   ;;  %v66_v34 = vld [vmem:[#allocation2 + $0x18] sm:$0xff] }
  0x32   :  { %v3535_v26 = vld [vmem:[#allocation5 + $0x8] sm:$0xff]   ;;  %v3539_v30 = vld [vmem:[#allocation5] sm:$0xff]   ;;  %v98_v36 = vld [vmem:[#allocation2 + $0x118] sm:$0xff] }
  0x33   :  { %3152 = vmatpush3.bf16.msra.mxu0 %v3519_v10  ;;  %v3536_v27 = vld [vmem:[#allocation5 + $0x88] sm:$0xff]   ;;  %v3540_v31 = vld [vmem:[#allocation5 + $0x80] sm:$0xff]   ;;  %v130_v39 = vpack.c.bf16 %v98_v36, %v66_v34  ;;  %v65_v41 = vld [vmem:[#allocation2 + $0x10] sm:$0xff] }
  0x34   :  { %3174 = vmatpush3.bf16.msra.mxu1 %v3520_v11  ;;  %3153 = vmatprep.subr.bf16.mxu0 %v3521_v12  ;;  %v64_v32 = vld [vmem:[#allocation2 + $0x8] sm:$0xff]  ;;  %v63_v37 = vld [vmem:[#allocation2] sm:$0xff]  ;;  %v97_v42 = vld [vmem:[#allocation2 + $0x110] sm:$0xff] }
  0x35   :  { %3175 = vmatprep.subr.bf16.mxu1 %v3522_v13  ;;  %v96_v33 = vld [vmem:[#allocation2 + $0x108] sm:$0xff]  ;;  %v95_v38 = vld [vmem:[#allocation2 + $0x100] sm:$0xff]  ;;  %v129_v43 = vpack.c.bf16 %v97_v42, %v65_v41  ;;  %v3541_v44 = vld [vmem:[#allocation5 + $0x178] sm:$0xff]   ;;  %2287 = vmatprep.mubr.bf16.mxu1 %v130_v39 }
  0x36   :  { %v128_v35 = vpack.c.bf16 %v96_v33, %v64_v32  ;;  %v127_v40 = vpack.c.bf16 %v95_v38, %v63_v37  ;;  %v3542_v45 = vld [vmem:[#allocation5 + $0x1f8] sm:$0xff]   ;;  %v3545_v48 = vld [vmem:[#allocation5 + $0x170] sm:$0xff]   ;;  %v3549_v52 = vld [vmem:[#allocation5 + $0x168] sm:$0xff]  }
  0x37   :  { %3154 = vmatpush3.bf16.msra.mxu0 %v3523_v14  ;;  %v3543_v46 = vld [vmem:[#allocation5 + $0x138] sm:$0xff]   ;;  %v3546_v49 = vld [vmem:[#allocation5 + $0x1f0] sm:$0xff]   ;;  %v3550_v53 = vld [vmem:[#allocation5 + $0x1e8] sm:$0xff]  }
  0x38   :  { %3176 = vmatpush3.bf16.msra.mxu1 %v3524_v15  ;;  %3155 = vmatprep.subr.bf16.mxu0 %v3525_v16  ;;  %v3544_v47 = vld [vmem:[#allocation5 + $0x1b8] sm:$0xff]   ;;  %v3547_v50 = vld [vmem:[#allocation5 + $0x130] sm:$0xff]   ;;  %v3551_v54 = vld [vmem:[#allocation5 + $0x128] sm:$0xff]  }
  0x39   :  { %3177 = vmatprep.subr.bf16.mxu1 %v3526_v17  ;;  %2246 = vmatprep.mubr.bf16.mxu0 %v128_v35  ;;  %v3548_v51 = vld [vmem:[#allocation5 + $0x1b0] sm:$0xff]   ;;  %v3552_v55 = vld [vmem:[#allocation5 + $0x1a8] sm:$0xff]   ;;  %v3553_v56 = vld [vmem:[#allocation5 + $0x160] sm:$0xff]  }
  0x3a   :  { %v3554_v57 = vld [vmem:[#allocation5 + $0x1e0] sm:$0xff]   ;;  %v3557_v60 = vld [vmem:[#allocation5 + $0x158] sm:$0xff]   ;;  %v3561_v0 = vld [vmem:[#allocation5 + $0x150] sm:$0xff]  }
  0x3b   :  { %3156 = vmatpush3.bf16.msra.mxu0 %v3527_v18  ;;  %v3555_v58 = vld [vmem:[#allocation5 + $0x120] sm:$0xff]   ;;  %v3558_v61 = vld [vmem:[#allocation5 + $0x1d8] sm:$0xff]   ;;  %v3562_v1 = vld [vmem:[#allocation5 + $0x1d0] sm:$0xff]  }
  0x3c   :  { %3178 = vmatpush3.bf16.msra.mxu1 %v3528_v19  ;;  %3157 = vmatprep.subr.bf16.mxu0 %v3529_v20  ;;  %v3556_v59 = vld [vmem:[#allocation5 + $0x1a0] sm:$0xff]   ;;  %v3559_v62 = vld [vmem:[#allocation5 + $0x118] sm:$0xff]   ;;  %v3563_v2 = vld [vmem:[#allocation5 + $0x110] sm:$0xff]  }
  0x3d   :  { %3179 = vmatprep.subr.bf16.mxu1 %v3530_v21  ;;  %v3560_v63 = vld [vmem:[#allocation5 + $0x198] sm:$0xff]   ;;  %v3564_v3 = vld [vmem:[#allocation5 + $0x190] sm:$0xff]   ;;  %v3565_v4 = vld [vmem:[#allocation5 + $0x148] sm:$0xff]  }
  0x3e   :  { %v3566_v5 = vld [vmem:[#allocation5 + $0x1c8] sm:$0xff]   ;;  %v3569_v8 = vld [vmem:[#allocation5 + $0x140] sm:$0xff]   ;;  %v70_v14 = vld [vmem:[#allocation2 + $0x38] sm:$0xff] }
  0x3f   :  { %3158 = vmatpush3.bf16.msra.mxu0 %v3531_v22  ;;  %v3567_v6 = vld [vmem:[#allocation5 + $0x108] sm:$0xff]   ;;  %v3570_v9 = vld [vmem:[#allocation5 + $0x1c0] sm:$0xff]   ;;  %v102_v15 = vld [vmem:[#allocation2 + $0x138] sm:$0xff] }
  0x40   :  { %3180 = vmatpush3.bf16.msra.mxu1 %v3532_v23  ;;  %3159 = vmatprep.subr.bf16.mxu0 %v3533_v24  ;;  %v3568_v7 = vld [vmem:[#allocation5 + $0x188] sm:$0xff]   ;;  %v3571_v10 = vld [vmem:[#allocation5 + $0x100] sm:$0xff]   ;;  %v134_v17 = vpack.c.bf16 %v102_v15, %v70_v14  ;;  %v69_v20 = vld [vmem:[#allocation2 + $0x30] sm:$0xff] }
  0x41   :  { %3181 = vmatprep.subr.bf16.mxu1 %v3534_v25  ;;  %v3572_v11 = vld [vmem:[#allocation5 + $0x180] sm:$0xff]   ;;  %v68_v12 = vld [vmem:[#allocation2 + $0x28] sm:$0xff]  ;;  %v101_v22 = vld [vmem:[#allocation2 + $0x130] sm:$0xff] }
  0x42   :  { %v100_v13 = vld [vmem:[#allocation2 + $0x128] sm:$0xff]  ;;  %v67_v18 = vld [vmem:[#allocation2 + $0x20] sm:$0xff]  ;;  %v133_v23 = vpack.c.bf16 %v101_v22, %v69_v20  ;;  %v3573_v24 = vld [vmem:[#allocation5 + $0x278] sm:$0xff]  }
  0x43   :  { %3160 = vmatpush3.bf16.msra.mxu0 %v3535_v26  ;;  %v132_v16 = vpack.c.bf16 %v100_v13, %v68_v12  ;;  %v99_v19 = vld [vmem:[#allocation2 + $0x120] sm:$0xff]  ;;  %v3574_v25 = vld [vmem:[#allocation5 + $0x2f8] sm:$0xff]   ;;  %v3581_v32 = vld [vmem:[#allocation5 + $0x268] sm:$0xff]  }
  0x44   :  { %3182 = vmatpush3.bf16.msra.mxu1 %v3536_v27  ;;  %3161 = vmatprep.subr.bf16.mxu0 %v3537_v28  ;;  %v131_v21 = vpack.c.bf16 %v99_v19, %v67_v18  ;;  %v3575_v26 = vld [vmem:[#allocation5 + $0x238] sm:$0xff]   ;;  %v3577_v28 = vld [vmem:[#allocation5 + $0x270] sm:$0xff]   ;;  %v3582_v33 = vld [vmem:[#allocation5 + $0x2e8] sm:$0xff]  }
  0x45   :  { %3183 = vmatprep.subr.bf16.mxu1 %v3538_v29  ;;  %v3576_v27 = vld [vmem:[#allocation5 + $0x2b8] sm:$0xff]   ;;  %v3578_v29 = vld [vmem:[#allocation5 + $0x2f0] sm:$0xff]   ;;  %v3583_v34 = vld [vmem:[#allocation5 + $0x228] sm:$0xff]  }
  0x46   :  { %v3584_v35 = vld [vmem:[#allocation5 + $0x2a8] sm:$0xff]   ;;  %v3585_v36 = vld [vmem:[#allocation5 + $0x260] sm:$0xff]   ;;  %v3590_v41 = vld [vmem:[#allocation5 + $0x2d8] sm:$0xff]  }
  0x47   :  { %3162 = vmatpush3.bf16.msra.mxu0 %v3539_v30  ;;  %v3579_v30 = vld [vmem:[#allocation5 + $0x230] sm:$0xff]   ;;  %v3586_v37 = vld [vmem:[#allocation5 + $0x2e0] sm:$0xff]   ;;  %v3591_v42 = vld [vmem:[#allocation5 + $0x218] sm:$0xff]  }
  0x48   :  { %3184 = vmatpush3.bf16.msra.mxu1 %v3540_v31  ;;  %3191 = vmatprep.subr.bf16.mxu0 %v3541_v44  ;;  %v3580_v31 = vld [vmem:[#allocation5 + $0x2b0] sm:$0xff]   ;;  %v3587_v38 = vld [vmem:[#allocation5 + $0x220] sm:$0xff]   ;;  %v3613_v12 = vld [vmem:[#allocation5 + $0x368] sm:$0xff]  }
  0x49   :  { %3213 = vmatprep.subr.bf16.mxu1 %v3542_v45  ;;  %v3588_v39 = vld [vmem:[#allocation5 + $0x2a0] sm:$0xff]   ;;  %v3593_v44 = vld [vmem:[#allocation5 + $0x250] sm:$0xff]   ;;  %v3614_v13 = vld [vmem:[#allocation5 + $0x3e8] sm:$0xff]  }
  0x4a   :  { %2247 = vmatmul.mubr.bf16.vlgmr.msra.gmra.mxu0 %v127_v40  ;;  %v3589_v40 = vld [vmem:[#allocation5 + $0x258] sm:$0xff]   ;;  %v3594_v45 = vld [vmem:[#allocation5 + $0x2d0] sm:$0xff]   ;;  %v3615_v14 = vld [vmem:[#allocation5 + $0x328] sm:$0xff]  }
  0x4b   :  { %2288 = vmatmul.mubr.bf16.vlgmr.msra.gmra.mxu1 %v129_v43  ;;  %3192 = vmatpush3.bf16.msra.mxu0 %v3543_v46  ;;  %v3592_v43 = vld [vmem:[#allocation5 + $0x298] sm:$0xff]   ;;  %v3595_v46 = vld [vmem:[#allocation5 + $0x210] sm:$0xff]   ;;  %v3616_v15 = vld [vmem:[#allocation5 + $0x3a8] sm:$0xff]  }
  0x4c   :  { %3214 = vmatpush3.bf16.msra.mxu1 %v3544_v47  ;;  %3193 = vmatprep.subr.bf16.mxu0 %v3545_v48  ;;  %v3596_v47 = vld [vmem:[#allocation5 + $0x290] sm:$0xff]   ;;  %v3597_v48 = vld [vmem:[#allocation5 + $0x248] sm:$0xff]   ;;  %v3619_v18 = vld [vmem:[#allocation5 + $0x320] sm:$0xff]  }
  0x4d   :  { %3215 = vmatprep.subr.bf16.mxu1 %v3546_v49  ;;  %2328 = vmatprep.mubr.bf16.mxu0 %v132_v16  ;;  %v3598_v49 = vld [vmem:[#allocation5 + $0x2c8] sm:$0xff]   ;;  %v3617_v16 = vld [vmem:[#allocation5 + $0x360] sm:$0xff]   ;;  %v3621_v20 = vld [vmem:[#allocation5 + $0x358] sm:$0xff]  }
  0x4e   :  { %2369 = vmatprep.mubr.bf16.mxu1 %v134_v17  ;;  %v3618_v17 = vld [vmem:[#allocation5 + $0x3e0] sm:$0xff]   ;;  %v3623_v22 = vld [vmem:[#allocation5 + $0x318] sm:$0xff]  }
  0x4f   :  { %3194 = vmatpush3.bf16.msra.mxu0 %v3547_v50  ;;  %v3599_v50 = vld [vmem:[#allocation5 + $0x208] sm:$0xff]   ;;  %v3620_v19 = vld [vmem:[#allocation5 + $0x3a0] sm:$0xff]  }
  0x50   :  { %3216 = vmatpush3.bf16.msra.mxu1 %v3548_v51  ;;  %3195 = vmatprep.subr.bf16.mxu0 %v3549_v52  ;;  %v3600_v51 = vld [vmem:[#allocation5 + $0x288] sm:$0xff]   ;;  %v3601_v52 = vld [vmem:[#allocation5 + $0x240] sm:$0xff]  }
  0x51   :  { %3217 = vmatprep.subr.bf16.mxu1 %v3550_v53  ;;  %v3602_v53 = vld [vmem:[#allocation5 + $0x2c0] sm:$0xff]  }
  0x53   :  { %3196 = vmatpush3.bf16.msra.mxu0 %v3551_v54  ;;  %v3603_v54 = vld [vmem:[#allocation5 + $0x200] sm:$0xff]  }
  0x54   :  { %3218 = vmatpush3.bf16.msra.mxu1 %v3552_v55  ;;  %3197 = vmatprep.subr.bf16.mxu0 %v3553_v56  ;;  %v3604_v55 = vld [vmem:[#allocation5 + $0x280] sm:$0xff]   ;;  %v72_v56 = vld [vmem:[#allocation2 + $0x48] sm:$0xff] }
  0x55   :  { %3219 = vmatprep.subr.bf16.mxu1 %v3554_v57  ;;  %v104_v57 = vld [vmem:[#allocation2 + $0x148] sm:$0xff] }
  0x57   :  { %3198 = vmatpush3.bf16.msra.mxu0 %v3555_v58  ;;  %v136_v58 = vpack.c.bf16 %v104_v57, %v72_v56  ;;  %v3645_v56 = vld [vmem:[#allocation5 + $0x468] sm:$0xff]  }
  0x58   :  { %3220 = vmatpush3.bf16.msra.mxu1 %v3556_v59  ;;  %3199 = vmatprep.subr.bf16.mxu0 %v3557_v60  ;;  %v74_v59 = vld [vmem:[#allocation2 + $0x58] sm:$0xff]  ;;  %v3646_v57 = vld [vmem:[#allocation5 + $0x4e8] sm:$0xff]  }
  0x59   :  { %3221 = vmatprep.subr.bf16.mxu1 %v3558_v61  ;;  %v106_v60 = vld [vmem:[#allocation2 + $0x158] sm:$0xff]  ;;  %v71_v61 = vld [vmem:[#allocation2 + $0x40] sm:$0xff] }
  0x5b   :  { %3200 = vmatpush3.bf16.msra.mxu0 %v3559_v62  ;;  %v138_v62 = vpack.c.bf16 %v106_v60, %v74_v59  ;;  %v3648_v59 = vld [vmem:[#allocation5 + $0x4a8] sm:$0xff]   ;;  %v3649_v60 = vld [vmem:[#allocation5 + $0x460] sm:$0xff]  }
  0x5c   :  { %3222 = vmatpush3.bf16.msra.mxu1 %v3560_v63  ;;  %3201 = vmatprep.subr.bf16.mxu0 %v3561_v0  ;;  %v103_v63 = vld [vmem:[#allocation2 + $0x140] sm:$0xff]  ;;  %v73_v0 = vld [vmem:[#allocation2 + $0x50] sm:$0xff] }
  0x5d   :  { %3223 = vmatprep.subr.bf16.mxu1 %v3562_v1  ;;  %v105_v1 = vld [vmem:[#allocation2 + $0x150] sm:$0xff] }
  0x5f   :  { %3202 = vmatpush3.bf16.msra.mxu0 %v3563_v2  ;;  %v135_v2 = vpack.c.bf16 %v103_v63, %v71_v61  ;;  %v3650_v61 = vld [vmem:[#allocation5 + $0x4e0] sm:$0xff]  }
  0x60   :  { %3224 = vmatpush3.bf16.msra.mxu1 %v3564_v3  ;;  %3203 = vmatprep.subr.bf16.mxu0 %v3565_v4  ;;  %v137_v3 = vpack.c.bf16 %v105_v1, %v73_v0  ;;  %v3605_v4 = vld [vmem:[#allocation5 + $0x378] sm:$0xff]   ;;  %v3652_v63 = vld [vmem:[#allocation5 + $0x4a0] sm:$0xff]  }
  0x61   :  { %3225 = vmatprep.subr.bf16.mxu1 %v3566_v5  ;;  %v3606_v5 = vld [vmem:[#allocation5 + $0x3f8] sm:$0xff]  }
  0x62   :  { %v3653_v0 = vld [vmem:[#allocation5 + $0x458] sm:$0xff]  }
  0x63   :  { %3204 = vmatpush3.bf16.msra.mxu0 %v3567_v6  ;;  %v3607_v6 = vld [vmem:[#allocation5 + $0x338] sm:$0xff]  }
  0x64   :  { %3226 = vmatpush3.bf16.msra.mxu1 %v3568_v7  ;;  %3205 = vmatprep.subr.bf16.mxu0 %v3569_v8  ;;  %v3608_v7 = vld [vmem:[#allocation5 + $0x3b8] sm:$0xff]   ;;  %v3609_v8 = vld [vmem:[#allocation5 + $0x370] sm:$0xff]  }
  0x65   :  { %3227 = vmatprep.subr.bf16.mxu1 %v3570_v9  ;;  %v3610_v9 = vld [vmem:[#allocation5 + $0x3f0] sm:$0xff]   ;;  %v3654_v1 = vld [vmem:[#allocation5 + $0x4d8] sm:$0xff]  }
  0x67   :  { %3206 = vmatpush3.bf16.msra.mxu0 %v3571_v10  ;;  %v3611_v10 = vld [vmem:[#allocation5 + $0x330] sm:$0xff]  }
  0x68   :  { %3228 = vmatpush3.bf16.msra.mxu1 %v3572_v11  ;;  %3235 = vmatprep.subr.bf16.mxu0 %v3573_v24  ;;  %v3612_v11 = vld [vmem:[#allocation5 + $0x3b0] sm:$0xff]  }
  0x69   :  { %3257 = vmatprep.subr.bf16.mxu1 %v3574_v25  ;;  %v3625_v24 = vld [vmem:[#allocation5 + $0x350] sm:$0xff]  }
  0x6a   :  { %2329 = vmatmul.mubr.bf16.vlgmr.msra.gmra.mxu0 %v131_v21  ;;  %v3622_v21 = vld [vmem:[#allocation5 + $0x3d8] sm:$0xff]   ;;  %v3626_v25 = vld [vmem:[#allocation5 + $0x3d0] sm:$0xff]  }
  0x6b   :  { %2370 = vmatmul.mubr.bf16.vlgmr.msra.gmra.mxu1 %v133_v23  ;;  %3236 = vmatpush3.bf16.msra.mxu0 %v3575_v26  ;;  %v3624_v23 = vld [vmem:[#allocation5 + $0x398] sm:$0xff]   ;;  %v3627_v26 = vld [vmem:[#allocation5 + $0x310] sm:$0xff]  }
  0x6c   :  { %3258 = vmatpush3.bf16.msra.mxu1 %v3576_v27  ;;  %3237 = vmatprep.subr.bf16.mxu0 %v3577_v28  ;;  %v3628_v27 = vld [vmem:[#allocation5 + $0x390] sm:$0xff]   ;;  %v3629_v28 = vld [vmem:[#allocation5 + $0x348] sm:$0xff]  }
  0x6d   :  { %3259 = vmatprep.subr.bf16.mxu1 %v3578_v29  ;;  %2410 = vmatprep.mubr.bf16.mxu0 %v136_v58  ;;  %v3630_v29 = vld [vmem:[#allocation5 + $0x3c8] sm:$0xff]  }
  0x6e   :  { %2451 = vmatprep.mubr.bf16.mxu1 %v138_v62  ;;  %v3647_v58 = vld [vmem:[#allocation5 + $0x428] sm:$0xff]   ;;  %v3651_v62 = vld [vmem:[#allocation5 + $0x420] sm:$0xff]  }
  0x6f   :  { %3238 = vmatpush3.bf16.msra.mxu0 %v3579_v30  ;;  %v3631_v30 = vld [vmem:[#allocation5 + $0x308] sm:$0xff]  }
  0x70   :  { %3260 = vmatpush3.bf16.msra.mxu1 %v3580_v31  ;;  %3239 = vmatprep.subr.bf16.mxu0 %v3581_v32  ;;  %v3632_v31 = vld [vmem:[#allocation5 + $0x388] sm:$0xff]   ;;  %v3633_v32 = vld [vmem:[#allocation5 + $0x340] sm:$0xff]  }
  0x71   :  { %3261 = vmatprep.subr.bf16.mxu1 %v3582_v33  ;;  %v3634_v33 = vld [vmem:[#allocation5 + $0x3c0] sm:$0xff]  }
  0x73   :  { %3240 = vmatpush3.bf16.msra.mxu0 %v3583_v34  ;;  %v3635_v34 = vld [vmem:[#allocation5 + $0x300] sm:$0xff]  }
  0x74   :  { %3262 = vmatpush3.bf16.msra.mxu1 %v3584_v35  ;;  %3241 = vmatprep.subr.bf16.mxu0 %v3585_v36  ;;  %v3636_v35 = vld [vmem:[#allocation5 + $0x380] sm:$0xff]   ;;  %v76_v36 = vld [vmem:[#allocation2 + $0x68] sm:$0xff] }
  0x75   :  { %3263 = vmatprep.subr.bf16.mxu1 %v3586_v37  ;;  %v108_v37 = vld [vmem:[#allocation2 + $0x168] sm:$0xff] }
  0x77   :  { %3242 = vmatpush3.bf16.msra.mxu0 %v3587_v38  ;;  %v78_v38 = vld [vmem:[#allocation2 + $0x78] sm:$0xff] }
  0x78   :  { %3264 = vmatpush3.bf16.msra.mxu1 %v3588_v39  ;;  %3243 = vmatprep.subr.bf16.mxu0 %v3589_v40  ;;  %v140_v39 = vpack.c.bf16 %v108_v37, %v76_v36  ;;  %v110_v40 = vld [vmem:[#allocation2 + $0x178] sm:$0xff]  ;;  %v3677_v36 = vld [vmem:[#allocation5 + $0x568] sm:$0xff]  }
  0x79   :  { %3265 = vmatprep.subr.bf16.mxu1 %v3590_v41  ;;  %v75_v41 = vld [vmem:[#allocation2 + $0x60] sm:$0xff]  ;;  %v3678_v37 = vld [vmem:[#allocation5 + $0x5e8] sm:$0xff]  }
  0x7b   :  { %3244 = vmatpush3.bf16.msra.mxu0 %v3591_v42  ;;  %v107_v42 = vld [vmem:[#allocation2 + $0x160] sm:$0xff] }
  0x7c   :  { %3266 = vmatpush3.bf16.msra.mxu1 %v3592_v43  ;;  %3245 = vmatprep.subr.bf16.mxu0 %v3593_v44  ;;  %v142_v43 = vpack.c.bf16 %v110_v40, %v78_v38  ;;  %v139_v44 = vpack.c.bf16 %v107_v42, %v75_v41  ;;  %v3679_v38 = vld [vmem:[#allocation5 + $0x528] sm:$0xff]   ;;  %v3681_v40 = vld [vmem:[#allocation5 + $0x560] sm:$0xff]  }
  0x7d   :  { %3267 = vmatprep.subr.bf16.mxu1 %v3594_v45  ;;  %v77_v45 = vld [vmem:[#allocation2 + $0x70] sm:$0xff]  ;;  %v3682_v41 = vld [vmem:[#allocation5 + $0x5e0] sm:$0xff]  }
  0x7e   :  { %v3683_v42 = vld [vmem:[#allocation5 + $0x520] sm:$0xff]  }
  0x7f   :  { %3246 = vmatpush3.bf16.msra.mxu0 %v3595_v46  ;;  %v109_v46 = vld [vmem:[#allocation2 + $0x170] sm:$0xff] }
  0x80   :  { %3268 = vmatpush3.bf16.msra.mxu1 %v3596_v47  ;;  %3247 = vmatprep.subr.bf16.mxu0 %v3597_v48  ;;  %v141_v47 = vpack.c.bf16 %v109_v46, %v77_v45  ;;  %v3637_v48 = vld [vmem:[#allocation5 + $0x478] sm:$0xff]  }
  0x81   :  { %3269 = vmatprep.subr.bf16.mxu1 %v3598_v49  ;;  %v3638_v49 = vld [vmem:[#allocation5 + $0x4f8] sm:$0xff]  }
  0x82   :  { %v3686_v45 = vld [vmem:[#allocation5 + $0x5d8] sm:$0xff]  }
  0x83   :  { %3248 = vmatpush3.bf16.msra.mxu0 %v3599_v50  ;;  %v3639_v50 = vld [vmem:[#allocation5 + $0x438] sm:$0xff]  }
  0x84   :  { %3270 = vmatpush3.bf16.msra.mxu1 %v3600_v51  ;;  %3249 = vmatprep.subr.bf16.mxu0 %v3601_v52  ;;  %v3640_v51 = vld [vmem:[#allocation5 + $0x4b8] sm:$0xff]   ;;  %v3641_v52 = vld [vmem:[#allocation5 + $0x470] sm:$0xff]  }
  0x85   :  { %3271 = vmatprep.subr.bf16.mxu1 %v3602_v53  ;;  %v3642_v53 = vld [vmem:[#allocation5 + $0x4f0] sm:$0xff]   ;;  %v3687_v46 = vld [vmem:[#allocation5 + $0x518] sm:$0xff]  }
  0x87   :  { %3250 = vmatpush3.bf16.msra.mxu0 %v3603_v54  ;;  %v3643_v54 = vld [vmem:[#allocation5 + $0x430] sm:$0xff]  }
  0x88   :  { %3272 = vmatpush3.bf16.msra.mxu1 %v3604_v55  ;;  %3279 = vmatprep.subr.bf16.mxu0 %v3605_v4  ;;  %v3644_v55 = vld [vmem:[#allocation5 + $0x4b0] sm:$0xff]  }
  0x89   :  { %3301 = vmatprep.subr.bf16.mxu1 %v3606_v5  ;;  %v3657_v4 = vld [vmem:[#allocation5 + $0x450] sm:$0xff]  }
  0x8a   :  { %2411 = vmatmul.mubr.bf16.vlgmr.msra.gmra.mxu0 %v135_v2  ;;  %v3655_v2 = vld [vmem:[#allocation5 + $0x418] sm:$0xff]   ;;  %v3658_v5 = vld [vmem:[#allocation5 + $0x4d0] sm:$0xff]  }
  0x8b   :  { %2452 = vmatmul.mubr.bf16.vlgmr.msra.gmra.mxu1 %v137_v3  ;;  %3280 = vmatpush3.bf16.msra.mxu0 %v3607_v6  ;;  %v3656_v3 = vld [vmem:[#allocation5 + $0x498] sm:$0xff]   ;;  %v3659_v6 = vld [vmem:[#allocation5 + $0x410] sm:$0xff]  }
  0x8c   :  { %3302 = vmatpush3.bf16.msra.mxu1 %v3608_v7  ;;  %3281 = vmatprep.subr.bf16.mxu0 %v3609_v8  ;;  %v3660_v7 = vld [vmem:[#allocation5 + $0x490] sm:$0xff]   ;;  %v3661_v8 = vld [vmem:[#allocation5 + $0x448] sm:$0xff]  }
  0x8d   :  { %3303 = vmatprep.subr.bf16.mxu1 %v3610_v9  ;;  %2492 = vmatprep.mubr.bf16.mxu0 %v140_v39  ;;  %v3662_v9 = vld [vmem:[#allocation5 + $0x4c8] sm:$0xff]  }
  0x8e   :  { %2533 = vmatprep.mubr.bf16.mxu1 %v142_v43  ;;  %v3680_v39 = vld [vmem:[#allocation5 + $0x5a8] sm:$0xff]   ;;  %v3684_v43 = vld [vmem:[#allocation5 + $0x5a0] sm:$0xff]  }
  0x8f   :  { %3282 = vmatpush3.bf16.msra.mxu0 %v3611_v10  ;;  %v3663_v10 = vld [vmem:[#allocation5 + $0x408] sm:$0xff]  }
  0x90   :  { %3304 = vmatpush3.bf16.msra.mxu1 %v3612_v11  ;;  %3283 = vmatprep.subr.bf16.mxu0 %v3613_v12  ;;  %v3664_v11 = vld [vmem:[#allocation5 + $0x488] sm:$0xff]   ;;  %v3665_v12 = vld [vmem:[#allocation5 + $0x440] sm:$0xff]  }
  0x91   :  { %3305 = vmatprep.subr.bf16.mxu1 %v3614_v13  ;;  %v3666_v13 = vld [vmem:[#allocation5 + $0x4c0] sm:$0xff]  }
  0x93   :  { %3284 = vmatpush3.bf16.msra.mxu0 %v3615_v14  ;;  %v3667_v14 = vld [vmem:[#allocation5 + $0x400] sm:$0xff]  }
  0x94   :  { %3306 = vmatpush3.bf16.msra.mxu1 %v3616_v15  ;;  %3285 = vmatprep.subr.bf16.mxu0 %v3617_v16  ;;  %v3668_v15 = vld [vmem:[#allocation5 + $0x480] sm:$0xff]   ;;  %v80_v16 = vld [vmem:[#allocation2 + $0x88] sm:$0xff] }
  0x95   :  { %3307 = vmatprep.subr.bf16.mxu1 %v3618_v17  ;;  %v112_v17 = vld [vmem:[#allocation2 + $0x188] sm:$0xff] }
  0x97   :  { %3286 = vmatpush3.bf16.msra.mxu0 %v3619_v18  ;;  %v82_v18 = vld [vmem:[#allocation2 + $0x98] sm:$0xff] }
  0x98   :  { %3308 = vmatpush3.bf16.msra.mxu1 %v3620_v19  ;;  %3287 = vmatprep.subr.bf16.mxu0 %v3621_v20  ;;  %v114_v19 = vld [vmem:[#allocation2 + $0x198] sm:$0xff]  ;;  %v144_v20 = vpack.c.bf16 %v112_v17, %v80_v16  ;;  %v3709_v16 = vld [vmem:[#allocation5 + $0x668] sm:$0xff]  }
  0x99   :  { %3309 = vmatprep.subr.bf16.mxu1 %v3622_v21  ;;  %v146_v21 = vpack.c.bf16 %v114_v19, %v82_v18  ;;  %v3710_v17 = vld [vmem:[#allocation5 + $0x6e8] sm:$0xff]  }
  0x9a   :  { %v3711_v18 = vld [vmem:[#allocation5 + $0x628] sm:$0xff]  }
  0x9b   :  { %3288 = vmatpush3.bf16.msra.mxu0 %v3623_v22  ;;  %v79_v22 = vld [vmem:[#allocation2 + $0x80] sm:$0xff]  ;;  %v3712_v19 = vld [vmem:[#allocation5 + $0x6a8] sm:$0xff]  }
  0x9c   :  { %3310 = vmatpush3.bf16.msra.mxu1 %v3624_v23  ;;  %3289 = vmatprep.subr.bf16.mxu0 %v3625_v24  ;;  %v111_v23 = vld [vmem:[#allocation2 + $0x180] sm:$0xff]  ;;  %v81_v24 = vld [vmem:[#allocation2 + $0x90] sm:$0xff] }
  0x9d   :  { %3311 = vmatprep.subr.bf16.mxu1 %v3626_v25  ;;  %v143_v25 = vpack.c.bf16 %v111_v23, %v79_v22  ;;  %v3715_v22 = vld [vmem:[#allocation5 + $0x620] sm:$0xff]  }
  0x9e   :  { %v3716_v23 = vld [vmem:[#allocation5 + $0x6a0] sm:$0xff]  }
  0x9f   :  { %3290 = vmatpush3.bf16.msra.mxu0 %v3627_v26  ;;  %v113_v26 = vld [vmem:[#allocation2 + $0x190] sm:$0xff] }
  0xa0   :  { %3312 = vmatpush3.bf16.msra.mxu1 %v3628_v27  ;;  %3291 = vmatprep.subr.bf16.mxu0 %v3629_v28  ;;  %v145_v27 = vpack.c.bf16 %v113_v26, %v81_v24  ;;  %v3669_v28 = vld [vmem:[#allocation5 + $0x578] sm:$0xff]  }
  0xa1   :  { %3313 = vmatprep.subr.bf16.mxu1 %v3630_v29  ;;  %v3670_v29 = vld [vmem:[#allocation5 + $0x5f8] sm:$0xff]  }
  0xa2   :  { %v3717_v24 = vld [vmem:[#allocation5 + $0x658] sm:$0xff]  }
  0xa3   :  { %3292 = vmatpush3.bf16.msra.mxu0 %v3631_v30  ;;  %v3671_v30 = vld [vmem:[#allocation5 + $0x538] sm:$0xff]  }
  0xa4   :  { %3314 = vmatpush3.bf16.msra.mxu1 %v3632_v31  ;;  %3293 = vmatprep.subr.bf16.mxu0 %v3633_v32  ;;  %v3672_v31 = vld [vmem:[#allocation5 + $0x5b8] sm:$0xff]   ;;  %v3673_v32 = vld [vmem:[#allocation5 + $0x570] sm:$0xff]  }
  0xa5   :  { %3315 = vmatprep.subr.bf16.mxu1 %v3634_v33  ;;  %v3674_v33 = vld [vmem:[#allocation5 + $0x5f0] sm:$0xff]   ;;  %v3719_v26 = vld [vmem:[#allocation5 + $0x618] sm:$0xff]  }
  0xa7   :  { %3294 = vmatpush3.bf16.msra.mxu0 %v3635_v34  ;;  %v3675_v34 = vld [vmem:[#allocation5 + $0x530] sm:$0xff]  }
  0xa8   :  { %3316 = vmatpush3.bf16.msra.mxu1 %v3636_v35  ;;  %3323 = vmatprep.subr.bf16.mxu0 %v3637_v48  ;;  %v3676_v35 = vld [vmem:[#allocation5 + $0x5b0] sm:$0xff]  }
  0xa9   :  { %3345 = vmatprep.subr.bf16.mxu1 %v3638_v49  ;;  %v3689_v48 = vld [vmem:[#allocation5 + $0x550] sm:$0xff]  }
  0xaa   :  { %2493 = vmatmul.mubr.bf16.vlgmr.msra.gmra.mxu0 %v139_v44  ;;  %v3685_v44 = vld [vmem:[#allocation5 + $0x558] sm:$0xff]   ;;  %v3690_v49 = vld [vmem:[#allocation5 + $0x5d0] sm:$0xff]  }
  0xab   :  { %2534 = vmatmul.mubr.bf16.vlgmr.msra.gmra.mxu1 %v141_v47  ;;  %3324 = vmatpush3.bf16.msra.mxu0 %v3639_v50  ;;  %v3688_v47 = vld [vmem:[#allocation5 + $0x598] sm:$0xff]   ;;  %v3691_v50 = vld [vmem:[#allocation5 + $0x510] sm:$0xff]  }
  0xac   :  { %3346 = vmatpush3.bf16.msra.mxu1 %v3640_v51  ;;  %3325 = vmatprep.subr.bf16.mxu0 %v3641_v52  ;;  %v3692_v51 = vld [vmem:[#allocation5 + $0x590] sm:$0xff]   ;;  %v3693_v52 = vld [vmem:[#allocation5 + $0x548] sm:$0xff]  }
  0xad   :  { %3347 = vmatprep.subr.bf16.mxu1 %v3642_v53  ;;  %2574 = vmatprep.mubr.bf16.mxu0 %v144_v20  ;;  %v3694_v53 = vld [vmem:[#allocation5 + $0x5c8] sm:$0xff]   ;;  %v3713_v20 = vld [vmem:[#allocation5 + $0x660] sm:$0xff]  }
  0xae   :  { %2615 = vmatprep.mubr.bf16.mxu1 %v146_v21  ;;  %v3714_v21 = vld [vmem:[#allocation5 + $0x6e0] sm:$0xff]  }
  0xaf   :  { %3326 = vmatpush3.bf16.msra.mxu0 %v3643_v54  ;;  %v3695_v54 = vld [vmem:[#allocation5 + $0x508] sm:$0xff]  }
  0xb0   :  { %3348 = vmatpush3.bf16.msra.mxu1 %v3644_v55  ;;  %3327 = vmatprep.subr.bf16.mxu0 %v3645_v56  ;;  %v3696_v55 = vld [vmem:[#allocation5 + $0x588] sm:$0xff]   ;;  %v3697_v56 = vld [vmem:[#allocation5 + $0x540] sm:$0xff]  }
  0xb1   :  { %3349 = vmatprep.subr.bf16.mxu1 %v3646_v57  ;;  %v3698_v57 = vld [vmem:[#allocation5 + $0x5c0] sm:$0xff]  }
  0xb3   :  { %3328 = vmatpush3.bf16.msra.mxu0 %v3647_v58  ;;  %v3699_v58 = vld [vmem:[#allocation5 + $0x500] sm:$0xff]  }
  0xb4   :  { %3350 = vmatpush3.bf16.msra.mxu1 %v3648_v59  ;;  %3329 = vmatprep.subr.bf16.mxu0 %v3649_v60  ;;  %v3700_v59 = vld [vmem:[#allocation5 + $0x580] sm:$0xff]   ;;  %v84_v60 = vld [vmem:[#allocation2 + $0xa8] sm:$0xff] }
  0xb5   :  { %3351 = vmatprep.subr.bf16.mxu1 %v3650_v61  ;;  %v116_v61 = vld [vmem:[#allocation2 + $0x1a8] sm:$0xff] }
  0xb7   :  { %3330 = vmatpush3.bf16.msra.mxu0 %v3651_v62  ;;  %v148_v62 = vpack.c.bf16 %v116_v61, %v84_v60  ;;  %v3741_v60 = vld [vmem:[#allocation5 + $0x768] sm:$0xff]  }
  0xb8   :  { %3352 = vmatpush3.bf16.msra.mxu1 %v3652_v63  ;;  %3331 = vmatprep.subr.bf16.mxu0 %v3653_v0  ;;  %v86_v63 = vld [vmem:[#allocation2 + $0xb8] sm:$0xff]  ;;  %v3742_v61 = vld [vmem:[#allocation5 + $0x7e8] sm:$0xff]  }
  0xb9   :  { %3353 = vmatprep.subr.bf16.mxu1 %v3654_v1  ;;  %v118_v0 = vld [vmem:[#allocation2 + $0x1b8] sm:$0xff]  ;;  %v83_v1 = vld [vmem:[#allocation2 + $0xa0] sm:$0xff] }
  0xbb   :  { %3332 = vmatpush3.bf16.msra.mxu0 %v3655_v2  ;;  %v150_v2 = vpack.c.bf16 %v118_v0, %v86_v63  ;;  %v3744_v63 = vld [vmem:[#allocation5 + $0x7a8] sm:$0xff]   ;;  %v3745_v0 = vld [vmem:[#allocation5 + $0x760] sm:$0xff]  }
  0xbc   :  { %3354 = vmatpush3.bf16.msra.mxu1 %v3656_v3  ;;  %3333 = vmatprep.subr.bf16.mxu0 %v3657_v4  ;;  %v115_v3 = vld [vmem:[#allocation2 + $0x1a0] sm:$0xff]  ;;  %v85_v4 = vld [vmem:[#allocation2 + $0xb0] sm:$0xff] }
  0xbd   :  { %3355 = vmatprep.subr.bf16.mxu1 %v3658_v5  ;;  %v117_v5 = vld [vmem:[#allocation2 + $0x1b0] sm:$0xff] }
  0xbf   :  { %3334 = vmatpush3.bf16.msra.mxu0 %v3659_v6  ;;  %v147_v6 = vpack.c.bf16 %v115_v3, %v83_v1  ;;  %v3746_v1 = vld [vmem:[#allocation5 + $0x7e0] sm:$0xff]  }
  0xc0   :  { %3356 = vmatpush3.bf16.msra.mxu1 %v3660_v7  ;;  %3335 = vmatprep.subr.bf16.mxu0 %v3661_v8  ;;  %v149_v7 = vpack.c.bf16 %v117_v5, %v85_v4  ;;  %v3701_v8 = vld [vmem:[#allocation5 + $0x678] sm:$0xff]   ;;  %v3748_v3 = vld [vmem:[#allocation5 + $0x7a0] sm:$0xff]  }
  0xc1   :  { %3357 = vmatprep.subr.bf16.mxu1 %v3662_v9  ;;  %v3702_v9 = vld [vmem:[#allocation5 + $0x6f8] sm:$0xff]  }
  0xc2   :  { %v3749_v4 = vld [vmem:[#allocation5 + $0x758] sm:$0xff]  }
  0xc3   :  { %3336 = vmatpush3.bf16.msra.mxu0 %v3663_v10  ;;  %v3703_v10 = vld [vmem:[#allocation5 + $0x638] sm:$0xff]  }
  0xc4   :  { %3358 = vmatpush3.bf16.msra.mxu1 %v3664_v11  ;;  %3337 = vmatprep.subr.bf16.mxu0 %v3665_v12  ;;  %v3704_v11 = vld [vmem:[#allocation5 + $0x6b8] sm:$0xff]   ;;  %v3705_v12 = vld [vmem:[#allocation5 + $0x670] sm:$0xff]  }
  0xc5   :  { %3359 = vmatprep.subr.bf16.mxu1 %v3666_v13  ;;  %v3706_v13 = vld [vmem:[#allocation5 + $0x6f0] sm:$0xff]   ;;  %v3750_v5 = vld [vmem:[#allocation5 + $0x7d8] sm:$0xff]  }
  0xc7   :  { %3338 = vmatpush3.bf16.msra.mxu0 %v3667_v14  ;;  %v3707_v14 = vld [vmem:[#allocation5 + $0x630] sm:$0xff]  }
  0xc8   :  { %3360 = vmatpush3.bf16.msra.mxu1 %v3668_v15  ;;  %3367 = vmatprep.subr.bf16.mxu0 %v3669_v28  ;;  %v3708_v15 = vld [vmem:[#allocation5 + $0x6b0] sm:$0xff]  }
  0xc9   :  { %3389 = vmatprep.subr.bf16.mxu1 %v3670_v29  ;;  %v3721_v28 = vld [vmem:[#allocation5 + $0x650] sm:$0xff]  }
  0xca   :  { %2575 = vmatmul.mubr.bf16.vlgmr.msra.gmra.mxu0 %v143_v25  ;;  %v3718_v25 = vld [vmem:[#allocation5 + $0x6d8] sm:$0xff]   ;;  %v3722_v29 = vld [vmem:[#allocation5 + $0x6d0] sm:$0xff]  }
  0xcb   :  { %2616 = vmatmul.mubr.bf16.vlgmr.msra.gmra.mxu1 %v145_v27  ;;  %3368 = vmatpush3.bf16.msra.mxu0 %v3671_v30  ;;  %v3720_v27 = vld [vmem:[#allocation5 + $0x698] sm:$0xff]   ;;  %v3723_v30 = vld [vmem:[#allocation5 + $0x610] sm:$0xff]  }
  0xcc   :  { %3390 = vmatpush3.bf16.msra.mxu1 %v3672_v31  ;;  %3369 = vmatprep.subr.bf16.mxu0 %v3673_v32  ;;  %v3724_v31 = vld [vmem:[#allocation5 + $0x690] sm:$0xff]   ;;  %v3725_v32 = vld [vmem:[#allocation5 + $0x648] sm:$0xff]  }
  0xcd   :  { %3391 = vmatprep.subr.bf16.mxu1 %v3674_v33  ;;  %2656 = vmatprep.mubr.bf16.mxu0 %v148_v62  ;;  %v3726_v33 = vld [vmem:[#allocation5 + $0x6c8] sm:$0xff]  }
  0xce   :  { %2697 = vmatprep.mubr.bf16.mxu1 %v150_v2  ;;  %v3743_v62 = vld [vmem:[#allocation5 + $0x728] sm:$0xff]   ;;  %v3747_v2 = vld [vmem:[#allocation5 + $0x720] sm:$0xff]  }
  0xcf   :  { %3370 = vmatpush3.bf16.msra.mxu0 %v3675_v34  ;;  %v3727_v34 = vld [vmem:[#allocation5 + $0x608] sm:$0xff]  }
  0xd0   :  { %3392 = vmatpush3.bf16.msra.mxu1 %v3676_v35  ;;  %3371 = vmatprep.subr.bf16.mxu0 %v3677_v36  ;;  %v3728_v35 = vld [vmem:[#allocation5 + $0x688] sm:$0xff]   ;;  %v3729_v36 = vld [vmem:[#allocation5 + $0x640] sm:$0xff]  }
  0xd1   :  { %3393 = vmatprep.subr.bf16.mxu1 %v3678_v37  ;;  %v3730_v37 = vld [vmem:[#allocation5 + $0x6c0] sm:$0xff]  }
  0xd3   :  { %3372 = vmatpush3.bf16.msra.mxu0 %v3679_v38  ;;  %v3731_v38 = vld [vmem:[#allocation5 + $0x600] sm:$0xff]  }
  0xd4   :  { %3394 = vmatpush3.bf16.msra.mxu1 %v3680_v39  ;;  %3373 = vmatprep.subr.bf16.mxu0 %v3681_v40  ;;  %v3732_v39 = vld [vmem:[#allocation5 + $0x680] sm:$0xff]   ;;  %v88_v40 = vld [vmem:[#allocation2 + $0xc8] sm:$0xff] }
  0xd5   :  { %3395 = vmatprep.subr.bf16.mxu1 %v3682_v41  ;;  %v120_v41 = vld [vmem:[#allocation2 + $0x1c8] sm:$0xff] }
  0xd7   :  { %3374 = vmatpush3.bf16.msra.mxu0 %v3683_v42  ;;  %v90_v42 = vld [vmem:[#allocation2 + $0xd8] sm:$0xff] }
  0xd8   :  { %3396 = vmatpush3.bf16.msra.mxu1 %v3684_v43  ;;  %3375 = vmatprep.subr.bf16.mxu0 %v3685_v44  ;;  %v152_v43 = vpack.c.bf16 %v120_v41, %v88_v40  ;;  %v122_v44 = vld [vmem:[#allocation2 + $0x1d8] sm:$0xff] }
  0xd9   :  { %3397 = vmatprep.subr.bf16.mxu1 %v3686_v45  ;;  %v87_v45 = vld [vmem:[#allocation2 + $0xc0] sm:$0xff] }
  0xdb   :  { %3376 = vmatpush3.bf16.msra.mxu0 %v3687_v46  ;;  %v119_v46 = vld [vmem:[#allocation2 + $0x1c0] sm:$0xff] }
  0xdc   :  { %3398 = vmatpush3.bf16.msra.mxu1 %v3688_v47  ;;  %3377 = vmatprep.subr.bf16.mxu0 %v3689_v48  ;;  %v154_v47 = vpack.c.bf16 %v122_v44, %v90_v42  ;;  %v151_v48 = vpack.c.bf16 %v119_v46, %v87_v45 }
  0xdd   :  { %3399 = vmatprep.subr.bf16.mxu1 %v3690_v49  ;;  %v89_v49 = vld [vmem:[#allocation2 + $0xd0] sm:$0xff] }
  0xdf   :  { %3378 = vmatpush3.bf16.msra.mxu0 %v3691_v50  ;;  %v121_v50 = vld [vmem:[#allocation2 + $0x1d0] sm:$0xff] }
  0xe0   :  { %3400 = vmatpush3.bf16.msra.mxu1 %v3692_v51  ;;  %3379 = vmatprep.subr.bf16.mxu0 %v3693_v52  ;;  %v153_v51 = vpack.c.bf16 %v121_v50, %v89_v49  ;;  %v3733_v52 = vld [vmem:[#allocation5 + $0x778] sm:$0xff]  }
  0xe1   :  { %3401 = vmatprep.subr.bf16.mxu1 %v3694_v53  ;;  %v3734_v53 = vld [vmem:[#allocation5 + $0x7f8] sm:$0xff]  }
  0xe3   :  { %3380 = vmatpush3.bf16.msra.mxu0 %v3695_v54  ;;  %v3735_v54 = vld [vmem:[#allocation5 + $0x738] sm:$0xff]  }
  0xe4   :  { %3402 = vmatpush3.bf16.msra.mxu1 %v3696_v55  ;;  %3381 = vmatprep.subr.bf16.mxu0 %v3697_v56  ;;  %v3736_v55 = vld [vmem:[#allocation5 + $0x7b8] sm:$0xff]   ;;  %v3737_v56 = vld [vmem:[#allocation5 + $0x770] sm:$0xff]  }
  0xe5   :  { %3403 = vmatprep.subr.bf16.mxu1 %v3698_v57  ;;  %v3738_v57 = vld [vmem:[#allocation5 + $0x7f0] sm:$0xff]  }
  0xe7   :  { %3382 = vmatpush3.bf16.msra.mxu0 %v3699_v58  ;;  %v3739_v58 = vld [vmem:[#allocation5 + $0x730] sm:$0xff]  }
  0xe8   :  { %3404 = vmatpush3.bf16.msra.mxu1 %v3700_v59  ;;  %3411 = vmatprep.subr.bf16.mxu0 %v3701_v8  ;;  %v3740_v59 = vld [vmem:[#allocation5 + $0x7b0] sm:$0xff]  }
  0xe9   :  { %3433 = vmatprep.subr.bf16.mxu1 %v3702_v9  ;;  %v3753_v8 = vld [vmem:[#allocation5 + $0x750] sm:$0xff]  }
  0xea   :  { %2657 = vmatmul.mubr.bf16.vlgmr.msra.gmra.mxu0 %v147_v6  ;;  %v3751_v6 = vld [vmem:[#allocation5 + $0x718] sm:$0xff]   ;;  %v3754_v9 = vld [vmem:[#allocation5 + $0x7d0] sm:$0xff]  }
  0xeb   :  { %2698 = vmatmul.mubr.bf16.vlgmr.msra.gmra.mxu1 %v149_v7  ;;  %3412 = vmatpush3.bf16.msra.mxu0 %v3703_v10  ;;  %v3752_v7 = vld [vmem:[#allocation5 + $0x798] sm:$0xff]   ;;  %v3755_v10 = vld [vmem:[#allocation5 + $0x710] sm:$0xff]  }
  0xec   :  { %3434 = vmatpush3.bf16.msra.mxu1 %v3704_v11  ;;  %3413 = vmatprep.subr.bf16.mxu0 %v3705_v12  ;;  %v3756_v11 = vld [vmem:[#allocation5 + $0x790] sm:$0xff]   ;;  %v3757_v12 = vld [vmem:[#allocation5 + $0x748] sm:$0xff]  }
  0xed   :  { %3435 = vmatprep.subr.bf16.mxu1 %v3706_v13  ;;  %2738 = vmatprep.mubr.bf16.mxu0 %v152_v43  ;;  %v3758_v13 = vld [vmem:[#allocation5 + $0x7c8] sm:$0xff]  }
  0xee   :  { %2779 = vmatprep.mubr.bf16.mxu1 %v154_v47 }
  0xef   :  { %3414 = vmatpush3.bf16.msra.mxu0 %v3707_v14  ;;  %v3759_v14 = vld [vmem:[#allocation5 + $0x708] sm:$0xff]  }
  0xf0   :  { %3436 = vmatpush3.bf16.msra.mxu1 %v3708_v15  ;;  %3415 = vmatprep.subr.bf16.mxu0 %v3709_v16  ;;  %v3760_v15 = vld [vmem:[#allocation5 + $0x788] sm:$0xff]   ;;  %v3761_v16 = vld [vmem:[#allocation5 + $0x740] sm:$0xff]  }
  0xf1   :  { %3437 = vmatprep.subr.bf16.mxu1 %v3710_v17  ;;  %v3762_v17 = vld [vmem:[#allocation5 + $0x7c0] sm:$0xff]  }
  0xf3   :  { %3416 = vmatpush3.bf16.msra.mxu0 %v3711_v18  ;;  %v3763_v18 = vld [vmem:[#allocation5 + $0x700] sm:$0xff]  }
  0xf4   :  { %3438 = vmatpush3.bf16.msra.mxu1 %v3712_v19  ;;  %3417 = vmatprep.subr.bf16.mxu0 %v3713_v20  ;;  %v3764_v19 = vld [vmem:[#allocation5 + $0x780] sm:$0xff]   ;;  %v92_v20 = vld [vmem:[#allocation2 + $0xe8] sm:$0xff] }
  0xf5   :  { %3439 = vmatprep.subr.bf16.mxu1 %v3714_v21  ;;  %v124_v21 = vld [vmem:[#allocation2 + $0x1e8] sm:$0xff] }
  0xf7   :  { %3418 = vmatpush3.bf16.msra.mxu0 %v3715_v22  ;;  %v94_v22 = vld [vmem:[#allocation2 + $0xf8] sm:$0xff] }
  0xf8   :  { %3440 = vmatpush3.bf16.msra.mxu1 %v3716_v23  ;;  %3419 = vmatprep.subr.bf16.mxu0 %v3717_v24  ;;  %v156_v23 = vpack.c.bf16 %v124_v21, %v92_v20  ;;  %v126_v24 = vld [vmem:[#allocation2 + $0x1f8] sm:$0xff] }
  0xf9   :  { %3441 = vmatprep.subr.bf16.mxu1 %v3718_v25  ;;  %v91_v25 = vld [vmem:[#allocation2 + $0xe0] sm:$0xff] }
  0xfb   :  { %3420 = vmatpush3.bf16.msra.mxu0 %v3719_v26  ;;  %v123_v26 = vld [vmem:[#allocation2 + $0x1e0] sm:$0xff] }
  0xfc   :  { %3442 = vmatpush3.bf16.msra.mxu1 %v3720_v27  ;;  %3421 = vmatprep.subr.bf16.mxu0 %v3721_v28  ;;  %v158_v27 = vpack.c.bf16 %v126_v24, %v94_v22  ;;  %v155_v28 = vpack.c.bf16 %v123_v26, %v91_v25 }
  0xfd   :  { %3443 = vmatprep.subr.bf16.mxu1 %v3722_v29  ;;  %v93_v29 = vld [vmem:[#allocation2 + $0xf0] sm:$0xff] }
  0xff   :  { %3422 = vmatpush3.bf16.msra.mxu0 %v3723_v30  ;;  %v125_v30 = vld [vmem:[#allocation2 + $0x1f0] sm:$0xff] }
 0x100   :  { %3444 = vmatpush3.bf16.msra.mxu1 %v3724_v31  ;;  %3423 = vmatprep.subr.bf16.mxu0 %v3725_v32  ;;  %v157_v31 = vpack.c.bf16 %v125_v30, %v93_v29 }
 0x101   :  { %3445 = vmatprep.subr.bf16.mxu1 %v3726_v33 }
 0x103   :  { %3424 = vmatpush3.bf16.msra.mxu0 %v3727_v34 }
 0x104   :  { %3446 = vmatpush3.bf16.msra.mxu1 %v3728_v35  ;;  %3425 = vmatprep.subr.bf16.mxu0 %v3729_v36 }
 0x105   :  { %3447 = vmatprep.subr.bf16.mxu1 %v3730_v37 }
 0x107   :  { %3426 = vmatpush3.bf16.msra.mxu0 %v3731_v38 }
 0x108   :  { %3448 = vmatpush3.bf16.msra.mxu1 %v3732_v39  ;;  %3455 = vmatprep.subr.bf16.mxu0 %v3733_v52 }
 0x109   :  { %3477 = vmatprep.subr.bf16.mxu1 %v3734_v53 }
 0x10a   :  { %2739 = vmatmul.mubr.bf16.vlgmr.msra.gmra.mxu0 %v151_v48  ;;  %v3163_v32 = vpop.f32.mrf.mxu0 }
 0x10b   :  { %2780 = vmatmul.mubr.bf16.vlgmr.msra.gmra.mxu1 %v153_v51  ;;  %3456 = vmatpush3.bf16.msra.mxu0 %v3735_v54  ;;  %v3185_v33 = vpop.f32.mrf.mxu1 }
 0x10c   :  { %3478 = vmatpush3.bf16.msra.mxu1 %v3736_v55  ;;  %3457 = vmatprep.subr.bf16.mxu0 %v3737_v56  ;;  %v3164_v34 = vpop.f32.mrf.mxu0 }
 0x10d   :  { %3479 = vmatprep.subr.bf16.mxu1 %v3738_v57  ;;  %2820 = vmatprep.mubr.bf16.mxu0 %v156_v23  ;;  %v3186_v35 = vpop.f32.mrf.mxu1 }
 0x10e   :  { %2861 = vmatprep.mubr.bf16.mxu1 %v158_v27  ;;  %v3166_v36 = vpop.f32.mrf.mxu0 }
 0x10f   :  { %3458 = vmatpush3.bf16.msra.mxu0 %v3739_v58  ;;  %v3188_v37 = vpop.f32.mrf.mxu1 }
 0x110   :  { %3480 = vmatpush3.bf16.msra.mxu1 %v3740_v59  ;;  %3459 = vmatprep.subr.bf16.mxu0 %v3741_v60  ;;  %v3167_v38 = vpop.f32.mrf.mxu0 }
 0x111   :  { %3481 = vmatprep.subr.bf16.mxu1 %v3742_v61  ;;  %v3189_v40 = vpop.f32.mrf.mxu1 }
 0x113   :  { %3460 = vmatpush3.bf16.msra.mxu0 %v3743_v62 }
 0x114   :  { %3482 = vmatpush3.bf16.msra.mxu1 %v3744_v63  ;;  %3461 = vmatprep.subr.bf16.mxu0 %v3745_v0 }
 0x115   :  { %3483 = vmatprep.subr.bf16.mxu1 %v3746_v1  ;;  %v3165_v1 = vadd.f32 %v3164_v34, %v3163_v32 }
 0x117   :  { %3462 = vmatpush3.bf16.msra.mxu0 %v3747_v2 }
 0x118   :  { %3484 = vmatpush3.bf16.msra.mxu1 %v3748_v3  ;;  %3463 = vmatprep.subr.bf16.mxu0 %v3749_v4  ;;  %v2890_v3 = vld [vmem:[%s3908_s2] ss:$0 sm:$0xff]  ;;  %s3858_s2 = smov [#allocation8]  }
 0x119   :  { %3485 = vmatprep.subr.bf16.mxu1 %v3750_v5  ;;  %v2249_v5 = vadd.f32 %v3165_v1, %v2890_v3  ;;  %s2877_s10 = sshll.u32 %s3858_s2, 4  ;;  %s2878_s10 = int_to_ptr.vmem [resolvable:$true] %s2877_s10 }
 0x11a   :  { %s3825_s11 = scalar_lea.vmem %s2878_s10, 256  ;;  %p3830_p2 = scmp.lt.s32.totalorder %s2878_s10, %s2878_s10 }
 0x11b   :  { %3464 = vmatpush3.bf16.msra.mxu0 %v3751_v6  ;;  %v3187_v6 = vadd.f32 %v3186_v35, %v3185_v33  ;;  %p3826_p1 = scmp.ne.s32.totalorder %s2878_s10, %s3825_s11  ;;  %p3831_p3 = scmp.lt.s32.totalorder %s3825_s11, %s3825_s11 }
 0x11c   :  { %3486 = vmatpush3.bf16.msra.mxu1 %v3752_v7  ;;  %3465 = vmatprep.subr.bf16.mxu0 %v3753_v8  ;;  %v3168_v7 = vadd.f32 %v3167_v38, %v3166_v36 }
 0x11d   :  { %3487 = vmatprep.subr.bf16.mxu1 %v3754_v9  ;;  %p3832_p4 = por %p3831_p3, %p3830_p2 }
 0x11f   :  { %3466 = vmatpush3.bf16.msra.mxu0 %v3755_v10  ;;  %p3833_p5 = pnand %p3832_p4, %p3826_p1 }
 0x120   :  { %3488 = vmatpush3.bf16.msra.mxu1 %v3756_v11  ;;  %3467 = vmatprep.subr.bf16.mxu0 %v3757_v12  ;;  %v2290_v11 = vadd.f32 %v3187_v6, %v2249_v5  ;;  %v2252_v12 = vadd.f32 %v3168_v7, %v2890_v3 }
 0x121   :  { %3489 = vmatprep.subr.bf16.mxu1 %v3758_v13 }
 0x123   :  { %3468 = vmatpush3.bf16.msra.mxu0 %v3759_v14 }
 0x124   :  { %3490 = vmatpush3.bf16.msra.mxu1 %v3760_v15  ;;  %3469 = vmatprep.subr.bf16.mxu0 %v3761_v16  ;;  %v3190_v15 = vadd.f32 %v3189_v40, %v3188_v37 }
 0x125   :  { %3491 = vmatprep.subr.bf16.mxu1 %v3762_v17 }
 0x126   :  { %v2293_v20 = vadd.f32 %v3190_v15, %v2252_v12 }
 0x127   :  { %3470 = vmatpush3.bf16.msra.mxu0 %v3763_v18 }
 0x128   :  { %3492 = vmatpush3.bf16.msra.mxu1 %v3764_v19 }
 0x12a   :  { %2821 = vmatmul.mubr.bf16.vlgmr.msra.gmra.mxu0 %v155_v28  ;;  %v3207_v39 = vpop.f32.mrf.mxu0 }
 0x12b   :  { %2862 = vmatmul.mubr.bf16.vlgmr.msra.gmra.mxu1 %v157_v31  ;;  %v3229_v41 = vpop.f32.mrf.mxu1 }
 0x12c   :  { %v3208_v42 = vpop.f32.mrf.mxu0 }
 0x12d   :  { %v3230_v43 = vpop.f32.mrf.mxu1  ;;  %v3209_v10 = vadd.f32 %v3208_v42, %v3207_v39 }
 0x12e   :  { %v3210_v44 = vpop.f32.mrf.mxu0  ;;  %v3231_v17 = vadd.f32 %v3230_v43, %v3229_v41 }
 0x12f   :  { %v3232_v45 = vpop.f32.mrf.mxu1  ;;  %v2331_v16 = vadd.f32 %v3209_v10, %v2290_v11 }
 0x130   :  { %v3211_v46 = vpop.f32.mrf.mxu0 }
 0x131   :  { %v3233_v48 = vpop.f32.mrf.mxu1  ;;  %v3212_v18 = vadd.f32 %v3211_v46, %v3210_v44  ;;  %v2372_v23 = vadd.f32 %v3231_v17, %v2331_v16 }
 0x132   :  { %v3234_v27 = vadd.f32 %v3233_v48, %v3232_v45 }
 0x133   :  { %v2334_v24 = vadd.f32 %v3212_v18, %v2293_v20 }
 0x135   :  { %v2375_v31 = vadd.f32 %v3234_v27, %v2334_v24 }
 0x14a   :  { %v3251_v47 = vpop.f32.mrf.mxu0 }
 0x14b   :  { %v3273_v49 = vpop.f32.mrf.mxu1 }
 0x14c   :  { %v3252_v50 = vpop.f32.mrf.mxu0 }
 0x14d   :  { %v3274_v51 = vpop.f32.mrf.mxu1  ;;  %v3253_v21 = vadd.f32 %v3252_v50, %v3251_v47 }
 0x14e   :  { %v3254_v52 = vpop.f32.mrf.mxu0  ;;  %v3275_v29 = vadd.f32 %v3274_v51, %v3273_v49 }
 0x14f   :  { %v3276_v53 = vpop.f32.mrf.mxu1  ;;  %v2413_v28 = vadd.f32 %v3253_v21, %v2372_v23 }
 0x150   :  { %v3255_v54 = vpop.f32.mrf.mxu0 }
 0x151   :  { %v3277_v56 = vpop.f32.mrf.mxu1  ;;  %v3256_v30 = vadd.f32 %v3255_v54, %v3254_v52  ;;  %v2454_v35 = vadd.f32 %v3275_v29, %v2413_v28 }
 0x152   :  { %v3278_v37 = vadd.f32 %v3277_v56, %v3276_v53 }
 0x153   :  { %v2416_v36 = vadd.f32 %v3256_v30, %v2375_v31 }
 0x155   :  { %v2457_v43 = vadd.f32 %v3278_v37, %v2416_v36 }
 0x16a   :  { %v3295_v55 = vpop.f32.mrf.mxu0 }
 0x16b   :  { %v3317_v57 = vpop.f32.mrf.mxu1 }
 0x16c   :  { %v3296_v58 = vpop.f32.mrf.mxu0 }
 0x16d   :  { %v3318_v59 = vpop.f32.mrf.mxu1  ;;  %v3297_v32 = vadd.f32 %v3296_v58, %v3295_v55 }
 0x16e   :  { %v3298_v60 = vpop.f32.mrf.mxu0  ;;  %v3319_v39 = vadd.f32 %v3318_v59, %v3317_v57 }
 0x16f   :  { %v3320_v61 = vpop.f32.mrf.mxu1  ;;  %v2495_v38 = vadd.f32 %v3297_v32, %v2454_v35 }
 0x170   :  { %v3299_v62 = vpop.f32.mrf.mxu0 }
 0x171   :  { %v3321_v0 = vpop.f32.mrf.mxu1  ;;  %v3300_v40 = vadd.f32 %v3299_v62, %v3298_v60  ;;  %v2536_v47 = vadd.f32 %v3319_v39, %v2495_v38 }
 0x172   :  { %v3322_v49 = vadd.f32 %v3321_v0, %v3320_v61 }
 0x173   :  { %v2498_v45 = vadd.f32 %v3300_v40, %v2457_v43 }
 0x175   :  { %v2539_v58 = vadd.f32 %v3322_v49, %v2498_v45 }
 0x18a   :  { %v3339_v63 = vpop.f32.mrf.mxu0 }
 0x18b   :  { %v3361_v2 = vpop.f32.mrf.mxu1 }
 0x18c   :  { %v3340_v4 = vpop.f32.mrf.mxu0 }
 0x18d   :  { %v3362_v8 = vpop.f32.mrf.mxu1  ;;  %v3341_v44 = vadd.f32 %v3340_v4, %v3339_v63 }
 0x18e   :  { %v3342_v9 = vpop.f32.mrf.mxu0  ;;  %v3363_v51 = vadd.f32 %v3362_v8, %v3361_v2 }
 0x18f   :  { %v3364_v13 = vpop.f32.mrf.mxu1  ;;  %v2577_v50 = vadd.f32 %v3341_v44, %v2536_v47 }
 0x190   :  { %v3343_v14 = vpop.f32.mrf.mxu0 }
 0x191   :  { %v3365_v22 = vpop.f32.mrf.mxu1  ;;  %v3344_v52 = vadd.f32 %v3343_v14, %v3342_v9  ;;  %v2618_v53 = vadd.f32 %v3363_v51, %v2577_v50 }
 0x192   :  { %v3366_v60 = vadd.f32 %v3365_v22, %v3364_v13 }
 0x193   :  { %v2580_v56 = vadd.f32 %v3344_v52, %v2539_v58 }
 0x195   :  { %v2621_v4 = vadd.f32 %v3366_v60, %v2580_v56 }
 0x1aa   :  { %v3383_v19 = vpop.f32.mrf.mxu0 }
 0x1ab   :  { %v3405_v25 = vpop.f32.mrf.mxu1 }
 0x1ac   :  { %v3384_v26 = vpop.f32.mrf.mxu0 }
 0x1ad   :  { %v3406_v33 = vpop.f32.mrf.mxu1  ;;  %v3385_v1 = vadd.f32 %v3384_v26, %v3383_v19 }
 0x1ae   :  { %v3386_v34 = vpop.f32.mrf.mxu0  ;;  %v3407_v3 = vadd.f32 %v3406_v33, %v3405_v25 }
 0x1af   :  { %v3408_v41 = vpop.f32.mrf.mxu1  ;;  %v2659_v62 = vadd.f32 %v3385_v1, %v2618_v53 }
 0x1b0   :  { %v3387_v42 = vpop.f32.mrf.mxu0 }
 0x1b1   :  { %v3409_v48 = vpop.f32.mrf.mxu1  ;;  %v3388_v63 = vadd.f32 %v3387_v42, %v3386_v34  ;;  %v2700_v61 = vadd.f32 %v3407_v3, %v2659_v62 }
 0x1b2   :  { %v3410_v2 = vadd.f32 %v3409_v48, %v3408_v41 }
 0x1b3   :  { %v2662_v0 = vadd.f32 %v3388_v63, %v2621_v4 }
 0x1b5   :  { %v2703_v14 = vadd.f32 %v3410_v2, %v2662_v0 }
 0x1ca   :  { %v3427_v46 = vpop.f32.mrf.mxu0 }
 0x1cb   :  { %v3449_v54 = vpop.f32.mrf.mxu1 }
 0x1cc   :  { %v3428_v55 = vpop.f32.mrf.mxu0 }
 0x1cd   :  { %v3450_v57 = vpop.f32.mrf.mxu1  ;;  %v3429_v5 = vadd.f32 %v3428_v55, %v3427_v46 }
 0x1ce   :  { %v3430_v59 = vpop.f32.mrf.mxu0  ;;  %v3451_v9 = vadd.f32 %v3450_v57, %v3449_v54 }
 0x1cf   :  { %v3452_v6 = vpop.f32.mrf.mxu1  ;;  %v2741_v8 = vadd.f32 %v3429_v5, %v2700_v61 }
 0x1d0   :  { %v3431_v7 = vpop.f32.mrf.mxu0 }
 0x1d1   :  { %v3432_v10 = vadd.f32 %v3431_v7, %v3430_v59  ;;  %v3453_v11 = vpop.f32.mrf.mxu1  ;;  %v2782_v17 = vadd.f32 %v3451_v9, %v2741_v8 }
 0x1d2   :  { %v3454_v21 = vadd.f32 %v3453_v11, %v3452_v6 }
 0x1d3   :  { %v2744_v13 = vadd.f32 %v3432_v10, %v2703_v14 }
 0x1d5   :  { %v2785_v26 = vadd.f32 %v3454_v21, %v2744_v13 }
 0x1ea   :  { %v3471_v12 = vpop.f32.mrf.mxu0 }
 0x1eb   :  { %v3493_v15 = vpop.f32.mrf.mxu1 }
 0x1ec   :  { %v3472_v16 = vpop.f32.mrf.mxu0 }
 0x1ed   :  { %v3473_v18 = vadd.f32 %v3472_v16, %v3471_v12  ;;  %v3494_v19 = vpop.f32.mrf.mxu1 }
 0x1ee   :  { %v3474_v20 = vpop.f32.mrf.mxu0  ;;  %v3495_v23 = vadd.f32 %v3494_v19, %v3493_v15 }
 0x1ef   :  { %v2823_v22 = vadd.f32 %v3473_v18, %v2782_v17  ;;  %v3496_v24 = vpop.f32.mrf.mxu1 }
 0x1f0   :  { %v3475_v25 = vpop.f32.mrf.mxu0 }
 0x1f1   :  { %v2864_v27 = vadd.f32 %v3495_v23, %v2823_v22  ;;  %v3476_v28 = vadd.f32 %v3475_v25, %v3474_v20  ;;  %v3497_v29 = vpop.f32.mrf.mxu1 }
 0x1f2   :  { %v3498_v31 = vadd.f32 %v3497_v29, %v3496_v24 }
 0x1f3   :  { %2870 = vst [vmem:[#allocation8] sm:$0xff] %v2864_v27  ;;  %v2826_v30 = vadd.f32 %v3476_v28, %v2785_v26 }
 0x1f5   :  { %v2867_v32 = vadd.f32 %v3498_v31, %v2826_v30 }
 0x1f7   :  { %2871 = vst [vmem:[#allocation8 + $0x8] sm:$0xff] %v2867_v32 }
 0x1f8   :  { %3836 = shalt.err (!%p3833_p5)
}
 0x1f9   :  { %s3859_s12 = smov 128   ;;  %s3860_s13 = smov 8  }
 0x1fa   :  { %2883 = dma.vmem_to_hbm [thread:$0]  %s2878_s10, 256, %s3911_s5, [#allocation4], %s3859_s12, %s3859_s12, %s3860_s13  }
 0x1fb   :  { %3849 = dma.done.wait [#allocation4], 256  }
 0x1fc   :  { %3850 = vsyncadd [#allocation4], 4294967040 }
 0x1fd   :  { %2887 = vsyncpa [#allocation3], 1 }
 0x1fe   :  { %2888 = vsyncpa [#allocation6], 1 }
 0x1ff   :  { %2889 = vsyncpa [#allocation4], 1 }

</bundles_post_ra>
